<compile_context>
chip_gen: v6e
topology: v6e:2x2x1
jax: 0.10.0
libtpu: 0.0.40
codegen_flags: <defaults>
</compile_context>

<pallas_src>
import functools

import jax
import jax.numpy as jnp
import numpy as np
from jax.experimental import pallas as pl
from jax.experimental.pallas import tpu as pltpu


def _round_up(x, m):
    return (x + m - 1) // m * m


def _num_tensorcores_per_chip():
    # v7x has 2 TensorCores per chip; v5e/v6e have 1.  Used only to decide
    # whether the conv1 'parallel' M axis should be split into >=2 blocks.
    try:
        kind = jax.devices()[0].device_kind.lower()
    except Exception:
        return 1
    return 2 if ("v7" in kind or "7x" in kind) else 1


# ----------------------------- Pallas kernels ------------------------------

def _gemm_bias_relu_kernel(x_ref, w_ref, b_ref, o_ref, acc_ref):
    """One (tm, tk) x (tk, Np) step of a K-tiled GEMM: relu(x @ w + b_rows)."""
    @pl.when(pl.program_id(1) == 0)
    def _init():
        acc_ref[...] = jnp.zeros_like(acc_ref)

    acc_ref[...] += jnp.dot(x_ref[...], w_ref[...],
                            preferred_element_type=jnp.float32)

    @pl.when(pl.program_id(1) == pl.num_programs(1) - 1)
    def _finalize():
        # b_ref is a per-row bias tile (tm, Np): conv bias + BN-shift border
        # correction, already combined in glue.
        o_ref[...] = jnp.maximum(acc_ref[...] + b_ref[...],
                                 0.0).astype(o_ref.dtype)


def _conv2_pool_linear_kernel(p_ref, w2_ref, b2_ref, wl_ref, bl_ref, o_ref,
                              *, batch, positions):
    """Fused tail, single grid step: conv2-as-GEMM over all B*9 rows + ReLU,
    max over the 9 spatial positions (== MaxPool2d(3) on the 3x3 map),
    then the Linear layer."""
    y = jnp.dot(p_ref[...], w2_ref[...], preferred_element_type=jnp.float32)
    y = jnp.maximum(y + b2_ref[...], 0.0)                    # (B*P, C2p)
    # Max over each batch's contiguous block of `positions` rows.  Static 2-D
    # slices + sublane reduce keep the lowering simple (no 3-D reshape).
    pooled = jnp.concatenate(
        [jnp.max(y[b * positions:(b + 1) * positions], axis=0, keepdims=True)
         for b in range(batch)], axis=0)                     # (B, C2p)
    o_ref[...] = (jnp.dot(pooled.astype(wl_ref.dtype), wl_ref[...],
                          preferred_element_type=jnp.float32) + bl_ref[...])


# ------------------------------ kernel wrappers -----------------------------

def gemm_bias_relu(x, w, bias_rows, *, out_dtype=jnp.bfloat16,
                   tm_max=256, tk_max=4096, num_cores=1):
    """relu(x @ w + bias_rows) with bf16 operands / f32 accumulation.

    bias_rows is a per-row (M, N) bias (conv bias + BN-shift border
    correction).  M is padded to a 16-row (bf16 sublane-packed) multiple,
    K to the K-tile, N to a lane multiple (128); padding is sliced off.
    """
    M, K = x.shape
    N = w.shape[1]
    tm = _round_up(-(-M // max(num_cores, 1)), 16)   # >=2 blocks on 2-TC chips
    tm = min(tm_max, tm)
    Mp = _round_up(M, tm)
    tk = min(tk_max, _round_up(K, 128))
    Kp = _round_up(K, tk)
    Np = _round_up(N, 128)

    xp = jnp.pad(x.astype(jnp.bfloat16), ((0, Mp - M), (0, Kp - K)))
    wp = jnp.pad(w.astype(jnp.bfloat16), ((0, Kp - K), (0, Np - N)))
    bp = jnp.pad(bias_rows.astype(jnp.float32), ((0, Mp - M), (0, Np - N)))

    out = pl.pallas_call(
        _gemm_bias_relu_kernel,
        out_shape=jax.ShapeDtypeStruct((Mp, Np), out_dtype),
        grid=(Mp // tm, Kp // tk),
        in_specs=[pl.BlockSpec((tm, tk), lambda i, k: (i, k)),
                  pl.BlockSpec((tk, Np), lambda i, k: (k, 0)),
                  pl.BlockSpec((tm, Np), lambda i, k: (i, 0))],
        out_specs=pl.BlockSpec((tm, Np), lambda i, k: (i, 0)),
        scratch_shapes=[pltpu.VMEM((tm, Np), jnp.float32)],
        compiler_params=pltpu.CompilerParams(
            dimension_semantics=("parallel", "arbitrary")),
    )(xp, wp, bp)
    return out[:M, :N]


def conv2_pool_linear(p2, w2, b2, wl, bl, *, batch, positions, out_len):
    """Fused conv2 + ReLU + MaxPool-over-positions + Linear (single grid step).

    p2: (B*P, K2) bf16 im2col patches, rows ordered (batch, position);
    w2: (K2, C2), b2: (C2,), wl: (C2, out_len), bl: (out_len,).
    Returns (B, out_len) float32.
    """
    M, K2 = p2.shape
    assert M == batch * positions, (M, batch, positions)
    C2 = w2.shape[1]
    C2p = _round_up(C2, 128)
    OUTp = _round_up(out_len, 128)

    w2p = jnp.pad(w2.astype(jnp.bfloat16), ((0, 0), (0, C2p - C2)))
    b2p = jnp.pad(b2.astype(jnp.float32), (0, C2p - C2)).reshape(1, C2p)
    wlp = jnp.pad(wl.astype(jnp.bfloat16),
                  ((0, C2p - C2), (0, OUTp - out_len)))
    blp = jnp.pad(bl.astype(jnp.float32), (0, OUTp - out_len)).reshape(1, OUTp)

    kernel = functools.partial(_conv2_pool_linear_kernel,
                               batch=batch, positions=positions)
    out = pl.pallas_call(
        kernel,
        out_shape=jax.ShapeDtypeStruct((batch, OUTp), jnp.float32),
        grid=(1,),
        in_specs=[pl.BlockSpec((M, K2), lambda i: (0, 0)),
                  pl.BlockSpec((K2, C2p), lambda i: (0, 0)),
                  pl.BlockSpec((1, C2p), lambda i: (0, 0)),
                  pl.BlockSpec((C2p, OUTp), lambda i: (0, 0)),
                  pl.BlockSpec((1, OUTp), lambda i: (0, 0))],
        out_specs=pl.BlockSpec((batch, OUTp), lambda i: (0, 0)),
        compiler_params=pltpu.CompilerParams(
            dimension_semantics=("arbitrary",)),
    )(p2, w2p, b2p, wlp, blp)
    return out[:, :out_len]


# --------------------------------- JAX glue ---------------------------------

def _im2col(x, k, stride, pad):
    # x: (B, H, W, C) -> (B, OH, OW, k*k*C), tap ordering (kh, kw, c).
    B, H, W, C = x.shape
    xp = jnp.pad(x, ((0, 0), (pad, pad), (pad, pad), (0, 0)))
    Hp, Wp = H + 2 * pad, W + 2 * pad
    OH = (Hp - k) // stride + 1
    OW = (Wp - k) // stride + 1
    cols = []
    for kh in range(k):
        for kw in range(k):
            sl = jax.lax.slice(
                xp, (0, kh, kw, 0),
                (B, kh + (OH - 1) * stride + 1, kw + (OW - 1) * stride + 1, C),
                (1, stride, stride, 1))
            cols.append(sl)
    return jnp.concatenate(cols, axis=-1), OH, OW


def rgb2hm_head_forward(x_nchw, params):
    x = jnp.transpose(x_nchw, (0, 2, 3, 1)).astype(jnp.float32)   # NCHW -> NHWC
    x = x - 0.5                                                   # normalize_image
    B, H, W, Cin = x.shape

    # BatchNorm2d (training mode, biased batch stats), FOLDED into conv1:
    #   pad(x*s + t) = pad(x)*s + t*mask
    #   => conv1(pad(xn)) = conv(pad(x), w1*s) + conv(t*mask, w1)
    # The second term is a tiny per-output-position correction (exact at the
    # zero-padded border), computed once with a cheap f32 conv of the
    # constant-t image.  This removes the full-resolution affine pass.
    mean = jnp.mean(x, axis=(0, 1, 2))
    var = jnp.var(x, axis=(0, 1, 2))
    s = params["bn_gamma"] / jnp.sqrt(var + 1e-5)
    t = params["bn_beta"] - mean * s
    # TODO(synk): BatchNorm running-statistics update (training-time side
    # effect) is not modeled; it does not affect the forward output.

    w1_hwio = jnp.transpose(params["w1"], (2, 3, 1, 0))           # (10,10,Cin,C1)
    C1 = w1_hwio.shape[-1]
    w1_fold = w1_hwio * s[None, None, :, None]                    # scale fold (f32)
    t_img = jnp.broadcast_to(t, (1, H, W, Cin)).astype(jnp.float32)
    corr = jax.lax.conv_general_dilated(                          # (1, 9, 9, C1)
        t_img, w1_hwio, (7, 7), ((1, 1), (1, 1)),
        dimension_numbers=("NHWC", "HWIO", "NHWC"),
        preferred_element_type=jnp.float32,
        precision=jax.lax.Precision.HIGHEST)

    # Conv1 (k=10, s=7, p=1) + ReLU as one flat (B*P1, K1) GEMM.
    # Patches are materialized in bf16 (cast BEFORE im2col).
    xb = x.astype(jnp.bfloat16)
    p1, oh1, ow1 = _im2col(xb, 10, 7, 1)
    K1 = 10 * 10 * Cin
    p1 = p1.reshape(B * oh1 * ow1, K1)
    bias1 = corr[0] + params["b1"]                                # (9, 9, C1)
    bias_rows = jnp.broadcast_to(
        bias1[None], (B, oh1, ow1, C1)).reshape(B * oh1 * ow1, C1)
    y1 = gemm_bias_relu(p1, w1_fold.reshape(K1, C1), bias_rows,
                        out_dtype=jnp.bfloat16,
                        num_cores=_num_tensorcores_per_chip())
    y1 = y1.reshape(B, oh1, ow1, C1)

    # Conv2 (k=5, s=3, p=1) + ReLU + MaxPool2d(3) + flatten + Linear, fused
    # into a single-step pallas_call (one (B*9, K2) GEMM + max over positions).
    C2 = params["w2"].shape[0]
    p2, oh2, ow2 = _im2col(y1, 5, 3, 1)
    assert (oh2, ow2) == (3, 3), (
        "fused MaxPool2d(3) tail assumes a 3x3 conv2 output; got "
        f"({oh2}, {ow2})")
    K2 = 5 * 5 * C1
    p2 = p2.reshape(B * oh2 * ow2, K2)
    w2m = jnp.transpose(params["w2"], (2, 3, 1, 0)).reshape(K2, C2)
    return conv2_pool_linear(p2, w2m, params["b2"],
                             params["w_lin"].T, params["b_lin"],
                             batch=B, positions=oh2 * ow2,
                             out_len=params["w_lin"].shape[0])


def reference_forward(x_nchw, params):
    # Independent mixed-precision reference: explicit BatchNorm, lax convs
    # with bf16 operands / f32 accumulation (same numerics recipe as kernels).
    x = jnp.transpose(x_nchw, (0, 2, 3, 1)).astype(jnp.float32) - 0.5
    mean = jnp.mean(x, axis=(0, 1, 2))
    var = jnp.var(x, axis=(0, 1, 2))
    xn = (x - mean) / jnp.sqrt(var + 1e-5) * params["bn_gamma"] + params["bn_beta"]
    dn = ("NHWC", "HWIO", "NHWC")
    w1 = jnp.transpose(params["w1"], (2, 3, 1, 0)).astype(jnp.bfloat16)
    y1 = jax.lax.conv_general_dilated(
        xn.astype(jnp.bfloat16), w1, (7, 7), ((1, 1), (1, 1)),
        dimension_numbers=dn, preferred_element_type=jnp.float32,
        precision=jax.lax.Precision.HIGHEST)
    y1 = jnp.maximum(y1 + params["b1"], 0.0)
    w2 = jnp.transpose(params["w2"], (2, 3, 1, 0)).astype(jnp.bfloat16)
    y2 = jax.lax.conv_general_dilated(
        y1.astype(jnp.bfloat16), w2, (3, 3), ((1, 1), (1, 1)),
        dimension_numbers=dn, preferred_element_type=jnp.float32,
        precision=jax.lax.Precision.HIGHEST)
    y2 = jnp.maximum(y2 + params["b2"], 0.0)
    B = x.shape[0]
    pooled = y2.reshape(B, -1, y2.shape[-1]).max(axis=1)
    return jnp.dot(pooled.astype(jnp.bfloat16),
                   params["w_lin"].T.astype(jnp.bfloat16),
                   preferred_element_type=jnp.float32) + params["b_lin"]


def init_params(key, num_channel, out_len):
    ks = jax.random.split(key, 8)
    return {
        "bn_gamma": 1.0 + 0.1 * jax.random.normal(ks[0], (num_channel,), jnp.float32),
        "bn_beta": 0.1 * jax.random.normal(ks[1], (num_channel,), jnp.float32),
        "w1": 0.05 * jax.random.normal(ks[2], (64, num_channel, 10, 10), jnp.float32),
        "b1": 0.05 * jax.random.normal(ks[3], (64,), jnp.float32),
        "w2": 0.05 * jax.random.normal(ks[4], (64, 64, 5, 5), jnp.float32),
        "b2": 0.05 * jax.random.normal(ks[5], (64,), jnp.float32),
        "w_lin": 0.05 * jax.random.normal(ks[6], (out_len, 64), jnp.float32),
        "b_lin": 0.05 * jax.random.normal(ks[7], (out_len,), jnp.float32),
    }


if __name__ == "__main__":
    # Geometry: 64x64 input -> conv1(10,7,1): 9x9 -> conv2(5,3,1): 3x3
    # -> MaxPool2d(3): 1x1 -> flatten = 64 features -> Linear(64, out_len).
    num_channel = 8      # small stand-in for the production 256 input channels
    out_len = 128        # small stand-in for the production output length
    B, H, W = 2, 64, 64

    key = jax.random.PRNGKey(0)
    pk, xk = jax.random.split(key)
    params = init_params(pk, num_channel, out_len)
    x = jax.random.normal(xk, (B, num_channel, H, W), jnp.float32)  # NCHW

    out = jax.block_until_ready(rgb2hm_head_forward(x, params))
    ref = jax.block_until_ready(reference_forward(x, params))

    assert out.shape == (B, out_len), out.shape
    # Slightly looser atol than before: the BN fold rounds (x, w*s) to bf16
    # instead of (x*s+t, w), so kernel/reference bf16 rounding is decorrelated.
    np.testing.assert_allclose(np.asarray(out), np.asarray(ref),
                               rtol=2e-2, atol=3e-2)
    print("KERNEL_OK")
</pallas_src>

<mosaic_0001>
module attributes {stable_mosaic.version = 11 : i64} {
  func.func @_gemm_bias_relu_kernel(%arg0: i32, %arg1: i32, %arg2: memref<176x896xbf16, #tpu.memory_space<vmem>>, %arg3: memref<896x128xbf16, #tpu.memory_space<vmem>>, %arg4: memref<176x128xf32, #tpu.memory_space<vmem>>, %arg5: memref<176x128xbf16, #tpu.memory_space<vmem>>, %arg6: memref<176x128xf32, #tpu.memory_space<vmem>>) attributes {dimension_semantics = [#tpu.dimension_semantics<parallel>, #tpu.dimension_semantics<arbitrary>], iteration_bounds = array<i64: 1, 1>, scalar_prefetch = 0 : i64, scratch_operands = 1 : i64, tpu.core_type = #tpu.core_type<tc>, window_params = [{transform_indices = @transform_0, window_bounds = array<i64: 176, 896>}, {transform_indices = @transform_1, window_bounds = array<i64: 896, 128>}, {transform_indices = @transform_2, window_bounds = array<i64: 176, 128>}, {transform_indices = @transform_3, window_bounds = array<i64: 176, 128>}]} {
    %c0_i32 = arith.constant 0 : i32
    %0 = arith.cmpi eq, %arg1, %c0_i32 : i32
    %1 = arith.extui %0 : i1 to i32
    %c0_i32_0 = arith.constant 0 : i32
    %2 = arith.cmpi ne, %1, %c0_i32_0 : i32
    scf.if %2 {
      %cst_10 = arith.constant 0.000000e+00 : f32
      %12 = vector.broadcast %cst_10 : f32 to vector<176x128xf32>
      %c0_11 = arith.constant 0 : index
      %c0_12 = arith.constant 0 : index
      %13 = vector.load %arg6[%c0_11, %c0_12] : memref<176x128xf32, #tpu.memory_space<vmem>>, vector<176x128xf32>
      tpu.vector_store %arg6[%c0_11, %c0_12], %12 {strides = array<i32>} : memref<176x128xf32, #tpu.memory_space<vmem>>, vector<176x128xf32>,
    } else {
    }
    %c0 = arith.constant 0 : index
    %c0_1 = arith.constant 0 : index
    %3 = vector.load %arg6[%c0, %c0_1] : memref<176x128xf32, #tpu.memory_space<vmem>>, vector<176x128xf32>
    %c0_2 = arith.constant 0 : index
    %c0_3 = arith.constant 0 : index
    %4 = vector.load %arg2[%c0_2, %c0_3] : memref<176x896xbf16, #tpu.memory_space<vmem>>, vector<176x896xbf16>
    %c0_4 = arith.constant 0 : index
    %c0_5 = arith.constant 0 : index
    %5 = vector.load %arg3[%c0_4, %c0_5] : memref<896x128xbf16, #tpu.memory_space<vmem>>, vector<896x128xbf16>
    %cst = arith.constant dense<0.000000e+00> : vector<176x128xf32>
    %6 = tpu.matmul %4, %5, %cst {dimension_numbers = #tpu.dot_dimension_numbers<[1], [0], [0], [1], [0, 0, 1, 1], [], []>} : vector<176x896xbf16>, vector<896x128xbf16>, vector<176x128xf32> -> vector<176x128xf32>
    %7 = arith.addf %3, %6 : vector<176x128xf32>
    %c0_6 = arith.constant 0 : index
    %c0_7 = arith.constant 0 : index
    %8 = vector.load %arg6[%c0_6, %c0_7] : memref<176x128xf32, #tpu.memory_space<vmem>>, vector<176x128xf32>
    tpu.vector_store %arg6[%c0_6, %c0_7], %7 {strides = array<i32>} : memref<176x128xf32, #tpu.memory_space<vmem>>, vector<176x128xf32>,
    %c0_i32_8 = arith.constant 0 : i32
    %9 = arith.cmpi eq, %arg1, %c0_i32_8 : i32
    %10 = arith.extui %9 : i1 to i32
    %c0_i32_9 = arith.constant 0 : i32
    %11 = arith.cmpi ne, %10, %c0_i32_9 : i32
    scf.if %11 {
      %c0_10 = arith.constant 0 : index
      %c0_11 = arith.constant 0 : index
      %12 = vector.load %arg6[%c0_10, %c0_11] : memref<176x128xf32, #tpu.memory_space<vmem>>, vector<176x128xf32>
      %c0_12 = arith.constant 0 : index
      %c0_13 = arith.constant 0 : index
      %13 = vector.load %arg4[%c0_12, %c0_13] : memref<176x128xf32, #tpu.memory_space<vmem>>, vector<176x128xf32>
      %14 = arith.addf %12, %13 : vector<176x128xf32>
      %cst_14 = arith.constant 0.000000e+00 : f32
      %15 = vector.broadcast %cst_14 : f32 to vector<176x128xf32>
      %16 = arith.maximumf %14, %15 : vector<176x128xf32>
      %17 = arith.truncf %16 : vector<176x128xf32> to vector<176x128xbf16>
      %c0_15 = arith.constant 0 : index
      %c0_16 = arith.constant 0 : index
      %18 = vector.load %arg5[%c0_15, %c0_16] : memref<176x128xbf16, #tpu.memory_space<vmem>>, vector<176x128xbf16>
      tpu.vector_store %arg5[%c0_15, %c0_16], %17 {strides = array<i32>} : memref<176x128xbf16, #tpu.memory_space<vmem>>, vector<176x128xbf16>,
    } else {
    }
    return
  }
  func.func @transform_0(%arg0: i32, %arg1: i32) -> (i32, i32) {
    %c0_i32 = arith.constant 0 : i32
    return %arg0, %arg1 : i32, i32
  }
  func.func @transform_1(%arg0: i32, %arg1: i32) -> (i32, i32) {
    %c0_i32 = arith.constant 0 : i32
    %c0_i32_0 = arith.constant 0 : i32
    return %arg1, %c0_i32 : i32, i32
  }
  func.func @transform_2(%arg0: i32, %arg1: i32) -> (i32, i32) {
    %c0_i32 = arith.constant 0 : i32
    %c0_i32_0 = arith.constant 0 : i32
    return %arg0, %c0_i32 : i32, i32
  }
  func.func @transform_3(%arg0: i32, %arg1: i32) -> (i32, i32) {
    %c0_i32 = arith.constant 0 : i32
    %c0_i32_0 = arith.constant 0 : i32
    return %arg0, %c0_i32 : i32, i32
  }
}

</mosaic_0001>

<bundles_post_ra>
// kernel: tpu_custom_call.1
= control target key start
LH: loop header
LB: loop body
LE: loop exit
PB: predicated region body
PF: predicated region fallthrough
CT: control target
= control target key end

     0   :  { %8 = vsyncpa [#allocation4], 0  ;;  %s2761_s0 = inlined_call_operand.hbm [shape: bf16[176,896], index: 0, kind: input, shape index: {}]   ;;  %s2762_s1 = inlined_call_operand.hbm [shape: bf16[896,128], index: 1, kind: input, shape index: {}]   ;;  %s2763_s2 = inlined_call_operand.hbm [shape: f32[176,128], index: 2, kind: input, shape index: {}]   ;;  %s2764_s3 = inlined_call_operand.hbm [shape: bf16[176,128], index: 3, kind: output, shape index: {}]  }
   0x1   :  { %9 = vsyncpa [#allocation7], 0 }
   0x2   :  { %10 = vsyncpa [#allocation5], 0  ;;  %s2615_s12 = smov [#allocation6]  }
   0x3   :  { %s28_s13 = sshll.u32 %s2615_s12, 4  ;;  %s29_s13 = int_to_ptr.vmem [resolvable:$true] %s28_s13 }
   0x4   :  { %s2537_s14 = scalar_lea.vmem %s29_s13, 7168  ;;  %p2542_p1 = scmp.lt.s32.totalorder %s29_s13, %s29_s13 }
   0x5   :  { %p2538_p0 = scmp.ne.s32.totalorder %s29_s13, %s2537_s14  ;;  %p2543_p2 = scmp.lt.s32.totalorder %s2537_s14, %s2537_s14 }
   0x7   :  { %p2544_p3 = por %p2543_p2, %p2542_p1 }
   0x9   :  { %p2545_p4 = pnand %p2544_p3, %p2538_p0 }
   0xb   :  { %2548 = shalt.err (!%p2545_p4)
}
   0xc   :  { %s2616_s15 = smov 64   ;;  %s2617_s16 = smov 4  }
   0xd   :  { %34 = dma.hbm_to_vmem [thread:$0]  %s2762_s1, 7168, %s29_s13, [#allocation7], %s2616_s15, %s2616_s15, %s2617_s16  }
   0xe   :  { %s2618_s19 = smov [#allocation3]  }
   0xf   :  { %s16_s20 = sshll.u32 %s2618_s19, 4  ;;  %s17_s20 = int_to_ptr.vmem [resolvable:$true] %s16_s20 }
  0x10   :  { %s2557_s21 = scalar_lea.vmem %s17_s20, 9856  ;;  %p2562_p6 = scmp.lt.s32.totalorder %s17_s20, %s17_s20 }
  0x11   :  { %p2558_p5 = scmp.ne.s32.totalorder %s17_s20, %s2557_s21  ;;  %p2563_p7 = scmp.lt.s32.totalorder %s2557_s21, %s2557_s21 }
  0x13   :  { %p2564_p8 = por %p2563_p7, %p2562_p6 }
  0x15   :  { %p2565_p9 = pnand %p2564_p8, %p2558_p5 }
  0x17   :  { %2568 = shalt.err (!%p2565_p9)
}
  0x18   :  { %s2619_s22 = smov 448   ;;  %s2620_s23 = smov 28  }
  0x19   :  { %22 = dma.hbm_to_vmem [thread:$0]  %s2761_s0, 9856, %s17_s20, [#allocation4], %s2619_s22, %s2619_s22, %s2620_s23  }
  0x1a   :  { %s2621_s26 = smov [#allocation8]  }
  0x1b   :  { %s40_s27 = sshll.u32 %s2621_s26, 4  ;;  %s41_s27 = int_to_ptr.vmem [resolvable:$true] %s40_s27 }
  0x1c   :  { %s2577_s1 = scalar_lea.vmem %s41_s27, 2816  ;;  %p2582_p11 = scmp.lt.s32.totalorder %s41_s27, %s41_s27 }
  0x1d   :  { %p2578_p10 = scmp.ne.s32.totalorder %s41_s27, %s2577_s1  ;;  %p2583_p12 = scmp.lt.s32.totalorder %s2577_s1, %s2577_s1 }
  0x1f   :  { %p2584_p13 = por %p2583_p12, %p2582_p11 }
  0x21   :  { %p2585_p0 = pnand %p2584_p13, %p2578_p10 }
  0x23   :  { %2588 = shalt.err (!%p2585_p0)
}
  0x24   :  { %s2622_s28 = smov 128   ;;  %s2623_s29 = smov 8  }
  0x25   :  { %46 = dma.hbm_to_vmem [thread:$0]  %s2763_s2, 2816, %s41_s27, [#allocation7], %s2622_s28, %s2622_s28, %s2623_s29  }
  0x26   :  { %2609 = dma.done.wait [#allocation4], 9856  }
  0x27   :  { %2610 = vsyncadd [#allocation4], 4294957440 }
  0x28   :  { %2611 = dma.done.wait [#allocation7], 9984  }
  0x29   :  { %2612 = vsyncadd [#allocation7], 4294957312  ;;  %v2363_v0 = vld [vmem:[#allocation6 + $0x78] sm:$0xff]   ;;  %v2367_v4 = vld [vmem:[#allocation6 + $0x70] sm:$0xff]   ;;  %v2624_v36 = vmov 0.0   ;;  %vm2625_vm0 = vmmov 0  }
  0x2a   :  { %v2364_v1 = vld [vmem:[#allocation6 + $0xf8] sm:$0xff]   ;;  %2026 = vmatprep.subr.bf16.mxu0 %v2363_v0  ;;  %v2368_v5 = vld [vmem:[#allocation6 + $0xf0] sm:$0xff]   ;;  %v2371_v8 = vld [vmem:[#allocation6 + $0x68] sm:$0xff]   ;;  %s2626_s0 = smov [#allocation9]  }
  0x2b   :  { %v2365_v2 = vld [vmem:[#allocation6 + $0x38] sm:$0xff]   ;;  %2108 = vmatprep.subr.bf16.mxu1 %v2364_v1  ;;  %v2369_v6 = vld [vmem:[#allocation6 + $0x30] sm:$0xff]   ;;  %v2372_v9 = vld [vmem:[#allocation6 + $0xe8] sm:$0xff]   ;;  %s1771_s2 = sshll.u32 %s2626_s0, 4  ;;  %s1772_s2 = int_to_ptr.vmem [resolvable:$true] %s1771_s2 }
  0x2c   :  { %v2366_v3 = vld [vmem:[#allocation6 + $0xb8] sm:$0xff]   ;;  %2027 = vmatpush3.bf16.msra.mxu0 %v2365_v2  ;;  %v2370_v7 = vld [vmem:[#allocation6 + $0xb0] sm:$0xff]   ;;  %v2373_v10 = vld [vmem:[#allocation6 + $0x28] sm:$0xff]   ;;  %s2589_s5 = scalar_lea.vmem %s1772_s2, 1408  ;;  %p2594_p2 = scmp.lt.s32.totalorder %s1772_s2, %s1772_s2 }
  0x2d   :  { %2109 = vmatpush3.bf16.msra.mxu1 %v2366_v3  ;;  %2028 = vmatprep.subr.bf16.mxu0 %v2367_v4  ;;  %v2374_v11 = vld [vmem:[#allocation6 + $0xa8] sm:$0xff]   ;;  %v2375_v12 = vld [vmem:[#allocation6 + $0x60] sm:$0xff]   ;;  %v2379_v16 = vld [vmem:[#allocation6 + $0x58] sm:$0xff]   ;;  %p2590_p1 = scmp.ne.s32.totalorder %s1772_s2, %s2589_s5  ;;  %p2595_p3 = scmp.lt.s32.totalorder %s2589_s5, %s2589_s5 }
  0x2e   :  { %2110 = vmatprep.subr.bf16.mxu1 %v2368_v5  ;;  %v2376_v13 = vld [vmem:[#allocation6 + $0xe0] sm:$0xff]   ;;  %v2380_v17 = vld [vmem:[#allocation6 + $0xd8] sm:$0xff]   ;;  %v2383_v20 = vld [vmem:[#allocation6 + $0x50] sm:$0xff]  }
  0x2f   :  { %v2377_v14 = vld [vmem:[#allocation6 + $0x20] sm:$0xff]   ;;  %v2381_v18 = vld [vmem:[#allocation6 + $0x18] sm:$0xff]   ;;  %v2384_v21 = vld [vmem:[#allocation6 + $0xd0] sm:$0xff]   ;;  %p2596_p4 = por %p2595_p3, %p2594_p2 }
  0x30   :  { %2029 = vmatpush3.bf16.msra.mxu0 %v2369_v6  ;;  %v2378_v15 = vld [vmem:[#allocation6 + $0xa0] sm:$0xff]   ;;  %v2382_v19 = vld [vmem:[#allocation6 + $0x98] sm:$0xff]   ;;  %v2385_v22 = vld [vmem:[#allocation6 + $0x10] sm:$0xff]  }
  0x31   :  { %2111 = vmatpush3.bf16.msra.mxu1 %v2370_v7  ;;  %2030 = vmatprep.subr.bf16.mxu0 %v2371_v8  ;;  %v2386_v23 = vld [vmem:[#allocation6 + $0x90] sm:$0xff]   ;;  %v2387_v24 = vld [vmem:[#allocation6 + $0x48] sm:$0xff]   ;;  %v2391_v28 = vld [vmem:[#allocation6 + $0x40] sm:$0xff]   ;;  %p2597_p5 = pnand %p2596_p4, %p2590_p1 }
  0x32   :  { %2112 = vmatprep.subr.bf16.mxu1 %v2372_v9  ;;  %v2388_v25 = vld [vmem:[#allocation6 + $0xc8] sm:$0xff]   ;;  %v2392_v29 = vld [vmem:[#allocation6 + $0xc0] sm:$0xff]   ;;  %v2395_v32 = vld [vmem:[#allocation3] ss:$28 sps:$4 sm:$0xff]  }
  0x33   :  { %v2389_v26 = vld [vmem:[#allocation6 + $0x8] sm:$0xff]   ;;  %v2393_v30 = vld [vmem:[#allocation6] sm:$0xff]   ;;  %v2397_v33 = vld [vmem:[#allocation3 + $0x4] ss:$28 sps:$4 sm:$0xff]  }
  0x34   :  { %2031 = vmatpush3.bf16.msra.mxu0 %v2373_v10  ;;  %v2390_v27 = vld [vmem:[#allocation6 + $0x88] sm:$0xff]   ;;  %v2394_v31 = vld [vmem:[#allocation6 + $0x80] sm:$0xff]   ;;  %1069 = vmatprep.mubr.bf16.mxu0 %v2397_v33  ;;  %v2401_v37 = vld [vmem:[#allocation6 + $0x178] sm:$0xff]  }
  0x35   :  { %2113 = vmatpush3.bf16.msra.mxu1 %v2374_v11  ;;  %2032 = vmatprep.subr.bf16.mxu0 %v2375_v12  ;;  %v2398_v34 = vld [vmem:[#allocation3 + $0x8] ss:$28 sps:$4 sm:$0xff]   ;;  %v2403_v39 = vld [vmem:[#allocation3 + $0x3c] ss:$28 sps:$4 sm:$0xff]   ;;  %v2412_v46 = vld [vmem:[#allocation3 + $0x74] ss:$28 sps:$4 sm:$0xff]  }
  0x36   :  { %2114 = vmatprep.subr.bf16.mxu1 %v2376_v13  ;;  %v2400_v35 = vld [vmem:[#allocation3 + $0xc] ss:$28 sps:$4 sm:$0xff]   ;;  %v2402_v38 = vld [vmem:[#allocation6 + $0x138] sm:$0xff]   ;;  %v2408_v42 = vld [vmem:[#allocation3 + $0x38] ss:$28 sps:$4 sm:$0xff]  }
  0x37   :  { %1190 = vmatprep.mubr.bf16.mxu1 %v2400_v35  ;;  %v2405_v40 = vld [vmem:[#allocation3 + $0x44] ss:$28 sps:$4 sm:$0xff]   ;;  %v2410_v44 = vld [vmem:[#allocation6 + $0x170] sm:$0xff]   ;;  %v2416_v49 = vld [vmem:[#allocation3 + $0x70] ss:$28 sps:$4 sm:$0xff]  }
  0x38   :  { %2033 = vmatpush3.bf16.msra.mxu0 %v2377_v14  ;;  %v2407_v41 = vld [vmem:[#allocation6 + $0x1b8] sm:$0xff]   ;;  %v2411_v45 = vld [vmem:[#allocation6 + $0x130] sm:$0xff]   ;;  %v2419_v50 = vld [vmem:[#allocation6 + $0x168] sm:$0xff]  }
  0x39   :  { %2115 = vmatpush3.bf16.msra.mxu1 %v2378_v15  ;;  %2034 = vmatprep.subr.bf16.mxu0 %v2379_v16  ;;  %v2409_v43 = vld [vmem:[#allocation3 + $0x40] ss:$28 sps:$4 sm:$0xff]   ;;  %v2417_v51 = vld [vmem:[#allocation3 + $0x78] ss:$28 sps:$4 sm:$0xff]   ;;  %v2420_v52 = vld [vmem:[#allocation3 + $0xac] ss:$28 sps:$4 sm:$0xff]  }
  0x3a   :  { %2116 = vmatprep.subr.bf16.mxu1 %v2380_v17  ;;  %v2414_v47 = vld [vmem:[#allocation3 + $0x7c] ss:$28 sps:$4 sm:$0xff]   ;;  %v2424_v53 = vld [vmem:[#allocation6 + $0x128] sm:$0xff]   ;;  %v2425_v56 = vld [vmem:[#allocation3 + $0xa8] ss:$28 sps:$4 sm:$0xff]  }
  0x3b   :  { %v2418_v48 = vld [vmem:[#allocation6 + $0x1b0] sm:$0xff]   ;;  %v2422_v54 = vld [vmem:[#allocation3 + $0xb4] ss:$28 sps:$4 sm:$0xff]   ;;  %v2434_v58 = vld [vmem:[#allocation6 + $0x160] sm:$0xff]  }
  0x3c   :  { %2035 = vmatpush3.bf16.msra.mxu0 %v2381_v18  ;;  %v2427_v55 = vld [vmem:[#allocation6 + $0x1a8] sm:$0xff]   ;;  %v2435_v59 = vld [vmem:[#allocation6 + $0x120] sm:$0xff]   ;;  %v2428_v60 = vld [vmem:[#allocation3 + $0xe4] ss:$28 sps:$4 sm:$0xff]  }
  0x3d   :  { %2117 = vmatpush3.bf16.msra.mxu1 %v2382_v19  ;;  %2036 = vmatprep.subr.bf16.mxu0 %v2383_v20  ;;  %v2426_v57 = vld [vmem:[#allocation3 + $0xb0] ss:$28 sps:$4 sm:$0xff]   ;;  %v2443_v63 = vld [vmem:[#allocation6 + $0x158] sm:$0xff]   ;;  %v2436_v3 = vld [vmem:[#allocation3 + $0x11c] ss:$28 sps:$4 sm:$0xff]  }
  0x3e   :  { %2118 = vmatprep.subr.bf16.mxu1 %v2384_v21  ;;  %v2430_v61 = vld [vmem:[#allocation3 + $0xec] ss:$28 sps:$4 sm:$0xff]   ;;  %v2444_v0 = vld [vmem:[#allocation6 + $0x118] sm:$0xff]   ;;  %v2456_v6 = vld [vmem:[#allocation6 + $0x150] sm:$0xff]  }
  0x3f   :  { %v2442_v62 = vld [vmem:[#allocation6 + $0x1a0] sm:$0xff]   ;;  %v2432_v1 = vld [vmem:[#allocation3 + $0xe0] ss:$28 sps:$4 sm:$0xff]   ;;  %v2440_v9 = vld [vmem:[#allocation3 + $0x118] ss:$28 sps:$4 sm:$0xff]  }
  0x40   :  { %2037 = vmatpush3.bf16.msra.mxu0 %v2385_v22  ;;  %v2433_v2 = vld [vmem:[#allocation3 + $0xe8] ss:$28 sps:$4 sm:$0xff]   ;;  %v2459_v7 = vld [vmem:[#allocation6 + $0x110] sm:$0xff]   ;;  %v2445_v11 = vld [vmem:[#allocation3 + $0x154] ss:$28 sps:$4 sm:$0xff]  }
  0x41   :  { %2119 = vmatpush3.bf16.msra.mxu1 %v2386_v23  ;;  %2038 = vmatprep.subr.bf16.mxu0 %v2387_v24  ;;  %v2451_v4 = vld [vmem:[#allocation6 + $0x198] sm:$0xff]   ;;  %v2460_v8 = vld [vmem:[#allocation6 + $0x190] sm:$0xff]   ;;  %v2467_v13 = vld [vmem:[#allocation6 + $0x148] sm:$0xff]  }
  0x42   :  { %2120 = vmatprep.subr.bf16.mxu1 %v2388_v25  ;;  %v2438_v5 = vld [vmem:[#allocation3 + $0x124] ss:$28 sps:$4 sm:$0xff]   ;;  %v2447_v12 = vld [vmem:[#allocation3 + $0x15c] ss:$28 sps:$4 sm:$0xff]   ;;  %v2468_v14 = vld [vmem:[#allocation6 + $0x108] sm:$0xff]  }
  0x43   :  { %v2441_v10 = vld [vmem:[#allocation3 + $0x120] ss:$28 sps:$4 sm:$0xff]   ;;  %v2449_v15 = vld [vmem:[#allocation3 + $0x150] ss:$28 sps:$4 sm:$0xff]   ;;  %v2450_v16 = vld [vmem:[#allocation3 + $0x158] ss:$28 sps:$4 sm:$0xff]  }
  0x44   :  { %2039 = vmatpush3.bf16.msra.mxu0 %v2389_v26  ;;  %v2452_v17 = vld [vmem:[#allocation3 + $0x18c] ss:$28 sps:$4 sm:$0xff]   ;;  %v2475_v18 = vld [vmem:[#allocation6 + $0x188] sm:$0xff]   ;;  %v2461_v25 = vld [vmem:[#allocation3 + $0x1c4] ss:$28 sps:$4 sm:$0xff]  }
  0x45   :  { %2121 = vmatpush3.bf16.msra.mxu1 %v2390_v27  ;;  %2040 = vmatprep.subr.bf16.mxu0 %v2391_v28  ;;  %v2476_v19 = vld [vmem:[#allocation6 + $0x140] sm:$0xff]   ;;  %v2454_v21 = vld [vmem:[#allocation3 + $0x194] ss:$28 sps:$4 sm:$0xff]   ;;  %v2465_v27 = vld [vmem:[#allocation3 + $0x1c0] ss:$28 sps:$4 sm:$0xff]  }
  0x46   :  { %2122 = vmatprep.subr.bf16.mxu1 %v2392_v29  ;;  %v2477_v20 = vld [vmem:[#allocation6 + $0x100] sm:$0xff]   ;;  %v2469_v29 = vld [vmem:[#allocation3 + $0x1fc] ss:$28 sps:$4 sm:$0xff]   ;;  %v2478_v33 = vld [vmem:[#allocation3 + $0x234] ss:$28 sps:$4 sm:$0xff]  }
  0x47   :  { %v2484_v22 = vld [vmem:[#allocation6 + $0x180] sm:$0xff]  }
  0x48   :  { %2041 = vmatpush3.bf16.msra.mxu0 %v2393_v30  ;;  %v2457_v23 = vld [vmem:[#allocation3 + $0x188] ss:$28 sps:$4 sm:$0xff]   ;;  %v2458_v24 = vld [vmem:[#allocation3 + $0x190] ss:$28 sps:$4 sm:$0xff]  }
  0x49   :  { %2123 = vmatpush3.bf16.msra.mxu1 %v2394_v31  ;;  %2190 = vmatprep.subr.bf16.mxu0 %v2401_v37  ;;  %v2463_v26 = vld [vmem:[#allocation3 + $0x1cc] ss:$28 sps:$4 sm:$0xff]   ;;  %v2471_v30 = vld [vmem:[#allocation3 + $0x204] ss:$28 sps:$4 sm:$0xff]   ;;  %v2473_v31 = vld [vmem:[#allocation3 + $0x1f8] ss:$28 sps:$4 sm:$0xff]  }
  0x4a   :  { %2291 = vmatprep.subr.bf16.mxu1 %v2624_v36  ;;  %v2466_v28 = vld [vmem:[#allocation3 + $0x1c8] ss:$28 sps:$4 sm:$0xff]   ;;  %v2482_v35 = vld [vmem:[#allocation3 + $0x230] ss:$28 sps:$4 sm:$0xff]   ;;  %v2483_v37 = vld [vmem:[#allocation3 + $0x238] ss:$28 sps:$4 sm:$0xff]  }
  0x4b   :  { %1070 = vmatmul.mubr.bf16.vlgmr.msra.gmra.mxu0 %v2395_v32  ;;  %v2474_v32 = vld [vmem:[#allocation3 + $0x200] ss:$28 sps:$4 sm:$0xff]  }
  0x4c   :  { %1191 = vmatmul.mubr.bf16.vlgmr.msra.gmra.mxu1 %v2398_v34  ;;  %2191 = vmatpush3.bf16.msra.mxu0 %v2402_v38  ;;  %v2480_v34 = vld [vmem:[#allocation3 + $0x23c] ss:$28 sps:$4 sm:$0xff]   ;;  %v2487_v38 = vld [vmem:[#allocation3 + $0x14] ss:$28 sps:$4 sm:$0xff]  }
  0x4d   :  { %1077 = vmatprep.mubr.bf16.mxu0 %v2403_v39  ;;  %1198 = vmatprep.mubr.bf16.mxu1 %v2405_v40  ;;  %v2485_v39 = vld [vmem:[#allocation3 + $0x10] ss:$28 sps:$4 sm:$0xff]   ;;  %v2488_v40 = vld [vmem:[#allocation3 + $0x18] ss:$28 sps:$4 sm:$0xff]  }
  0x4e   :  { %2292 = vmatpush3.bf16.msra.mxu1 %v2407_v41  ;;  %2192 = vmatprep.subr.bf16.mxu0 %v2410_v44  ;;  %v2489_v41 = vld [vmem:[#allocation3 + $0x4c] ss:$28 sps:$4 sm:$0xff]   ;;  %v2493_v44 = vld [vmem:[#allocation3 + $0x84] ss:$28 sps:$4 sm:$0xff]  }
  0x4f   :  { %2293 = vmatprep.subr.bf16.mxu1 %v2624_v36 }
  0x50   :  { %2193 = vmatpush3.bf16.msra.mxu0 %v2411_v45  ;;  %v2495_v45 = vld [vmem:[#allocation3 + $0x80] ss:$28 sps:$4 sm:$0xff]  }
  0x51   :  { %2194 = vmatprep.subr.bf16.mxu0 %v2419_v50  ;;  %v2501_v50 = vld [vmem:[#allocation3 + $0xf4] ss:$28 sps:$4 sm:$0xff]  }
  0x52   :  { %2294 = vmatpush3.bf16.msra.mxu1 %v2418_v48  ;;  %v2499_v48 = vld [vmem:[#allocation3 + $0xb8] ss:$28 sps:$4 sm:$0xff]  }
  0x53   :  { %1078 = vmatmul.mubr.bf16.gmra.mxu0 %v2408_v42  ;;  %2295 = vmatprep.subr.bf16.mxu1 %v2624_v36  ;;  %v2491_v42 = vld [vmem:[#allocation3 + $0x48] ss:$28 sps:$4 sm:$0xff]  }
  0x54   :  { %1199 = vmatmul.mubr.bf16.gmra.mxu1 %v2409_v43  ;;  %1085 = vmatprep.mubr.bf16.mxu0 %v2412_v46  ;;  %v2492_v43 = vld [vmem:[#allocation3 + $0x50] ss:$28 sps:$4 sm:$0xff]   ;;  %v2496_v46 = vld [vmem:[#allocation3 + $0x88] ss:$28 sps:$4 sm:$0xff]  }
  0x55   :  { %1206 = vmatprep.mubr.bf16.mxu1 %v2414_v47  ;;  %2195 = vmatpush3.bf16.msra.mxu0 %v2424_v53  ;;  %v2497_v47 = vld [vmem:[#allocation3 + $0xbc] ss:$28 sps:$4 sm:$0xff]   ;;  %v2505_v53 = vld [vmem:[#allocation3 + $0x12c] ss:$28 sps:$4 sm:$0xff]  }
  0x56   :  { %2296 = vmatpush3.bf16.msra.mxu1 %v2427_v55  ;;  %2196 = vmatprep.subr.bf16.mxu0 %v2434_v58  ;;  %v2508_v55 = vld [vmem:[#allocation3 + $0x130] ss:$28 sps:$4 sm:$0xff]   ;;  %v2512_v58 = vld [vmem:[#allocation3 + $0x168] ss:$28 sps:$4 sm:$0xff]  }
  0x57   :  { %2297 = vmatprep.subr.bf16.mxu1 %v2624_v36 }
  0x59   :  { %2197 = vmatpush3.bf16.msra.mxu0 %v2435_v59  ;;  %v2513_v59 = vld [vmem:[#allocation3 + $0x19c] ss:$28 sps:$4 sm:$0xff]  }
  0x5a   :  { %2298 = vmatpush3.bf16.msra.mxu1 %v2442_v62  ;;  %2198 = vmatprep.subr.bf16.mxu0 %v2443_v63  ;;  %v2517_v62 = vld [vmem:[#allocation3 + $0x1d4] ss:$28 sps:$4 sm:$0xff]  }
  0x5b   :  { %1086 = vmatmul.mubr.bf16.gmra.mxu0 %v2416_v49  ;;  %2299 = vmatprep.subr.bf16.mxu1 %v2624_v36  ;;  %v2500_v49 = vld [vmem:[#allocation3 + $0xc0] ss:$28 sps:$4 sm:$0xff]   ;;  %v2519_v63 = vld [vmem:[#allocation3 + $0x1d0] ss:$28 sps:$4 sm:$0xff]  }
  0x5c   :  { %1207 = vmatmul.mubr.bf16.gmra.mxu1 %v2417_v51  ;;  %1093 = vmatprep.mubr.bf16.mxu0 %v2420_v52  ;;  %v2503_v51 = vld [vmem:[#allocation3 + $0xf0] ss:$28 sps:$4 sm:$0xff]   ;;  %v2504_v52 = vld [vmem:[#allocation3 + $0xf8] ss:$28 sps:$4 sm:$0xff]  }
  0x5d   :  { %1214 = vmatprep.mubr.bf16.mxu1 %v2422_v54  ;;  %2199 = vmatpush3.bf16.msra.mxu0 %v2444_v0  ;;  %v2507_v54 = vld [vmem:[#allocation3 + $0x128] ss:$28 sps:$4 sm:$0xff]   ;;  %v2520_v0 = vld [vmem:[#allocation3 + $0x1d8] ss:$28 sps:$4 sm:$0xff]  }
  0x5e   :  { %2300 = vmatpush3.bf16.msra.mxu1 %v2451_v4  ;;  %2200 = vmatprep.subr.bf16.mxu0 %v2456_v6  ;;  %v2525_v4 = vld [vmem:[#allocation3 + $0x244] ss:$28 sps:$4 sm:$0xff]  }
  0x5f   :  { %2301 = vmatprep.subr.bf16.mxu1 %v2624_v36  ;;  %v2528_v6 = vld [vmem:[#allocation3 + $0x248] ss:$28 sps:$4 sm:$0xff]  }
  0x61   :  { %2201 = vmatpush3.bf16.msra.mxu0 %v2459_v7 }
  0x62   :  { %2302 = vmatpush3.bf16.msra.mxu1 %v2460_v8  ;;  %2202 = vmatprep.subr.bf16.mxu0 %v2467_v13 }
  0x63   :  { %1094 = vmatmul.mubr.bf16.gmra.mxu0 %v2425_v56  ;;  %2303 = vmatprep.subr.bf16.mxu1 %v2624_v36  ;;  %v2509_v56 = vld [vmem:[#allocation3 + $0x164] ss:$28 sps:$4 sm:$0xff]  }
  0x64   :  { %1215 = vmatmul.mubr.bf16.gmra.mxu1 %v2426_v57  ;;  %1101 = vmatprep.mubr.bf16.mxu0 %v2428_v60  ;;  %v2511_v57 = vld [vmem:[#allocation3 + $0x160] ss:$28 sps:$4 sm:$0xff]   ;;  %v2515_v60 = vld [vmem:[#allocation3 + $0x198] ss:$28 sps:$4 sm:$0xff]  }
  0x65   :  { %1222 = vmatprep.mubr.bf16.mxu1 %v2430_v61  ;;  %2203 = vmatpush3.bf16.msra.mxu0 %v2468_v14  ;;  %v2516_v61 = vld [vmem:[#allocation3 + $0x1a0] ss:$28 sps:$4 sm:$0xff]  }
  0x66   :  { %2304 = vmatpush3.bf16.msra.mxu1 %v2475_v18  ;;  %2204 = vmatprep.subr.bf16.mxu0 %v2476_v19 }
  0x67   :  { %2305 = vmatprep.subr.bf16.mxu1 %v2624_v36 }
  0x69   :  { %2205 = vmatpush3.bf16.msra.mxu0 %v2477_v20 }
  0x6a   :  { %2306 = vmatpush3.bf16.msra.mxu1 %v2484_v22 }
  0x6b   :  { %1102 = vmatmul.mubr.bf16.gmra.mxu0 %v2432_v1  ;;  %v2521_v1 = vld [vmem:[#allocation3 + $0x20c] ss:$28 sps:$4 sm:$0xff]  }
  0x6c   :  { %1223 = vmatmul.mubr.bf16.gmra.mxu1 %v2433_v2  ;;  %1109 = vmatprep.mubr.bf16.mxu0 %v2436_v3  ;;  %v2523_v2 = vld [vmem:[#allocation3 + $0x208] ss:$28 sps:$4 sm:$0xff]   ;;  %v2524_v3 = vld [vmem:[#allocation3 + $0x210] ss:$28 sps:$4 sm:$0xff]  }
  0x6d   :  { %1230 = vmatprep.mubr.bf16.mxu1 %v2438_v5  ;;  %v2527_v5 = vld [vmem:[#allocation3 + $0x240] ss:$28 sps:$4 sm:$0xff]  }
  0x73   :  { %1110 = vmatmul.mubr.bf16.gmra.mxu0 %v2440_v9 }
  0x74   :  { %1231 = vmatmul.mubr.bf16.gmra.mxu1 %v2441_v10  ;;  %1117 = vmatprep.mubr.bf16.mxu0 %v2445_v11 }
  0x75   :  { %1238 = vmatprep.mubr.bf16.mxu1 %v2447_v12 }
  0x7b   :  { %1118 = vmatmul.mubr.bf16.gmra.mxu0 %v2449_v15 }
  0x7c   :  { %1239 = vmatmul.mubr.bf16.gmra.mxu1 %v2450_v16  ;;  %1125 = vmatprep.mubr.bf16.mxu0 %v2452_v17 }
  0x7d   :  { %1246 = vmatprep.mubr.bf16.mxu1 %v2454_v21 }
  0x83   :  { %1126 = vmatmul.mubr.bf16.gmra.mxu0 %v2457_v23 }
  0x84   :  { %1247 = vmatmul.mubr.bf16.gmra.mxu1 %v2458_v24  ;;  %1133 = vmatprep.mubr.bf16.mxu0 %v2461_v25 }
  0x85   :  { %1254 = vmatprep.mubr.bf16.mxu1 %v2463_v26 }
  0x8b   :  { %1134 = vmatmul.mubr.bf16.gmra.mxu0 %v2465_v27 }
  0x8c   :  { %1255 = vmatmul.mubr.bf16.gmra.mxu1 %v2466_v28  ;;  %1141 = vmatprep.mubr.bf16.mxu0 %v2469_v29 }
  0x8d   :  { %1262 = vmatprep.mubr.bf16.mxu1 %v2471_v30 }
  0x93   :  { %1142 = vmatmul.mubr.bf16.gmra.mxu0 %v2473_v31 }
  0x94   :  { %1263 = vmatmul.mubr.bf16.gmra.mxu1 %v2474_v32  ;;  %1149 = vmatprep.mubr.bf16.mxu0 %v2478_v33 }
  0x95   :  { %1270 = vmatprep.mubr.bf16.mxu1 %v2480_v34 }
  0x9b   :  { %1150 = vmatmul.mubr.bf16.gmra.mxu0 %v2482_v35 }
  0x9c   :  { %1271 = vmatmul.mubr.bf16.gmra.mxu1 %v2483_v37  ;;  %1311 = vmatprep.mubr.bf16.mxu0 %v2487_v38 }
  0x9d   :  { %2307 = vmatprep.mubr.msk.bf16.mxu1 %vm2625_vm0, %v2624_v36 }
  0xa3   :  { %1312 = vmatmul.mubr.bf16.vlgmr.msra.gmra.mxu0 %v2485_v39 }
  0xa4   :  { %2308 = vmatmul.mubr.bf16.vlgmr.msra.gmra.mxu1 %v2488_v40  ;;  %1319 = vmatprep.mubr.bf16.mxu0 %v2489_v41 }
  0xa5   :  { %2311 = vmatprep.mubr.msk.bf16.mxu1 %vm2625_vm0, %v2624_v36 }
  0xab   :  { %1320 = vmatmul.mubr.bf16.gmra.mxu0 %v2491_v42 }
  0xac   :  { %2312 = vmatmul.mubr.bf16.gmra.mxu1 %v2492_v43  ;;  %1327 = vmatprep.mubr.bf16.mxu0 %v2493_v44 }
  0xad   :  { %2315 = vmatprep.mubr.msk.bf16.mxu1 %vm2625_vm0, %v2624_v36 }
  0xb3   :  { %1328 = vmatmul.mubr.bf16.gmra.mxu0 %v2495_v45 }
  0xb4   :  { %2316 = vmatmul.mubr.bf16.gmra.mxu1 %v2496_v46  ;;  %1335 = vmatprep.mubr.bf16.mxu0 %v2497_v47 }
  0xb5   :  { %2319 = vmatprep.mubr.msk.bf16.mxu1 %vm2625_vm0, %v2624_v36 }
  0xbb   :  { %1336 = vmatmul.mubr.bf16.gmra.mxu0 %v2499_v48 }
  0xbc   :  { %2320 = vmatmul.mubr.bf16.gmra.mxu1 %v2500_v49  ;;  %1343 = vmatprep.mubr.bf16.mxu0 %v2501_v50 }
  0xbd   :  { %2323 = vmatprep.mubr.msk.bf16.mxu1 %vm2625_vm0, %v2624_v36 }
  0xc3   :  { %1344 = vmatmul.mubr.bf16.gmra.mxu0 %v2503_v51 }
  0xc4   :  { %2324 = vmatmul.mubr.bf16.gmra.mxu1 %v2504_v52  ;;  %1351 = vmatprep.mubr.bf16.mxu0 %v2505_v53 }
  0xc5   :  { %2327 = vmatprep.mubr.msk.bf16.mxu1 %vm2625_vm0, %v2624_v36 }
  0xcb   :  { %1352 = vmatmul.mubr.bf16.gmra.mxu0 %v2507_v54 }
  0xcc   :  { %2328 = vmatmul.mubr.bf16.gmra.mxu1 %v2508_v55  ;;  %1359 = vmatprep.mubr.bf16.mxu0 %v2509_v56 }
  0xcd   :  { %2331 = vmatprep.mubr.msk.bf16.mxu1 %vm2625_vm0, %v2624_v36 }
  0xd3   :  { %1360 = vmatmul.mubr.bf16.gmra.mxu0 %v2511_v57 }
  0xd4   :  { %2332 = vmatmul.mubr.bf16.gmra.mxu1 %v2512_v58  ;;  %1367 = vmatprep.mubr.bf16.mxu0 %v2513_v59 }
  0xd5   :  { %2335 = vmatprep.mubr.msk.bf16.mxu1 %vm2625_vm0, %v2624_v36 }
  0xdb   :  { %1368 = vmatmul.mubr.bf16.gmra.mxu0 %v2515_v60 }
  0xdc   :  { %2336 = vmatmul.mubr.bf16.gmra.mxu1 %v2516_v61  ;;  %1375 = vmatprep.mubr.bf16.mxu0 %v2517_v62 }
  0xdd   :  { %2339 = vmatprep.mubr.msk.bf16.mxu1 %vm2625_vm0, %v2624_v36 }
  0xe3   :  { %1376 = vmatmul.mubr.bf16.gmra.mxu0 %v2519_v63 }
  0xe4   :  { %2340 = vmatmul.mubr.bf16.gmra.mxu1 %v2520_v0  ;;  %1383 = vmatprep.mubr.bf16.mxu0 %v2521_v1 }
  0xe5   :  { %2343 = vmatprep.mubr.msk.bf16.mxu1 %vm2625_vm0, %v2624_v36 }
  0xeb   :  { %1384 = vmatmul.mubr.bf16.gmra.mxu0 %v2523_v2 }
  0xec   :  { %2344 = vmatmul.mubr.bf16.gmra.mxu1 %v2524_v3  ;;  %1391 = vmatprep.mubr.bf16.mxu0 %v2525_v4 }
  0xed   :  { %2347 = vmatprep.mubr.msk.bf16.mxu1 %vm2625_vm0, %v2624_v36 }
  0xf3   :  { %1392 = vmatmul.mubr.bf16.gmra.mxu0 %v2527_v5 }
  0xf4   :  { %2348 = vmatmul.mubr.bf16.gmra.mxu1 %v2528_v6 }
 0x10b   :  { %v2042_v7 = vpop.f32.mrf.mxu0 }
 0x10c   :  { %v2124_v8 = vpop.f32.mrf.mxu1 }
 0x10d   :  { %v2043_v9 = vpop.f32.mrf.mxu0 }
 0x10e   :  { %v2044_v10 = vadd.f32 %v2043_v9, %v2042_v7  ;;  %v2125_v11 = vpop.f32.mrf.mxu1 }
 0x10f   :  { %v2126_v12 = vadd.f32 %v2125_v11, %v2124_v8  ;;  %v2045_v13 = vpop.f32.mrf.mxu0 }
 0x110   :  { %v2127_v14 = vpop.f32.mrf.mxu1 }
 0x111   :  { %v2689_v15 = vadd.f32 %v2126_v12, %v2044_v10  ;;  %v2046_v16 = vpop.f32.mrf.mxu0 }
 0x112   :  { %v2047_v17 = vadd.f32 %v2046_v16, %v2045_v13  ;;  %v2128_v18 = vpop.f32.mrf.mxu1 }
 0x113   :  { %v2129_v19 = vadd.f32 %v2128_v18, %v2127_v14  ;;  %v2048_v20 = vpop.f32.mrf.mxu0 }
 0x114   :  { %v2130_v36 = vpop.f32.mrf.mxu1 }
 0x115   :  { %v2691_v21 = vadd.f32 %v2129_v19, %v2047_v17  ;;  %v2049_v22 = vpop.f32.mrf.mxu0 }
 0x116   :  { %v2050_v23 = vadd.f32 %v2049_v22, %v2048_v20  ;;  %v2131_v24 = vpop.f32.mrf.mxu1 }
 0x117   :  { %v2132_v25 = vadd.f32 %v2131_v24, %v2130_v36  ;;  %v2051_v26 = vpop.f32.mrf.mxu0 }
 0x118   :  { %v2133_v27 = vpop.f32.mrf.mxu1 }
 0x119   :  { %v2693_v28 = vadd.f32 %v2132_v25, %v2050_v23  ;;  %v2052_v29 = vpop.f32.mrf.mxu0 }
 0x11a   :  { %v2053_v30 = vadd.f32 %v2052_v29, %v2051_v26  ;;  %v2134_v31 = vpop.f32.mrf.mxu1 }
 0x11b   :  { %v2135_v32 = vadd.f32 %v2134_v31, %v2133_v27  ;;  %v2054_v33 = vpop.f32.mrf.mxu0 }
 0x11c   :  { %v2136_v34 = vpop.f32.mrf.mxu1 }
 0x11d   :  { %v2695_v35 = vadd.f32 %v2135_v32, %v2053_v30  ;;  %v2055_v37 = vpop.f32.mrf.mxu0 }
 0x11e   :  { %v2056_v38 = vadd.f32 %v2055_v37, %v2054_v33  ;;  %v2137_v39 = vpop.f32.mrf.mxu1 }
 0x11f   :  { %v2138_v40 = vadd.f32 %v2137_v39, %v2136_v34  ;;  %v2057_v41 = vpop.f32.mrf.mxu0 }
 0x120   :  { %v2139_v42 = vpop.f32.mrf.mxu1 }
 0x121   :  { %v2697_v43 = vadd.f32 %v2138_v40, %v2056_v38  ;;  %v2058_v44 = vpop.f32.mrf.mxu0 }
 0x122   :  { %v2059_v45 = vadd.f32 %v2058_v44, %v2057_v41  ;;  %v2140_v46 = vpop.f32.mrf.mxu1 }
 0x123   :  { %v2141_v47 = vadd.f32 %v2140_v46, %v2139_v42  ;;  %v2060_v48 = vpop.f32.mrf.mxu0 }
 0x124   :  { %v2142_v49 = vpop.f32.mrf.mxu1 }
 0x125   :  { %v2699_v50 = vadd.f32 %v2141_v47, %v2059_v45  ;;  %v2061_v51 = vpop.f32.mrf.mxu0 }
 0x126   :  { %v2062_v52 = vadd.f32 %v2061_v51, %v2060_v48  ;;  %v2143_v53 = vpop.f32.mrf.mxu1 }
 0x127   :  { %v2144_v54 = vadd.f32 %v2143_v53, %v2142_v49  ;;  %v2063_v55 = vpop.f32.mrf.mxu0 }
 0x128   :  { %v2145_v56 = vpop.f32.mrf.mxu1 }
 0x129   :  { %v2701_v57 = vadd.f32 %v2144_v54, %v2062_v52  ;;  %v2064_v58 = vpop.f32.mrf.mxu0 }
 0x12a   :  { %v2065_v59 = vadd.f32 %v2064_v58, %v2063_v55  ;;  %v2146_v60 = vpop.f32.mrf.mxu1 }
 0x12b   :  { %v2147_v61 = vadd.f32 %v2146_v60, %v2145_v56  ;;  %v2066_v62 = vpop.f32.mrf.mxu0 }
 0x12c   :  { %v2148_v63 = vpop.f32.mrf.mxu1 }
 0x12d   :  { %v2703_v0 = vadd.f32 %v2147_v61, %v2065_v59  ;;  %v2067_v1 = vpop.f32.mrf.mxu0 }
 0x12e   :  { %v2068_v2 = vadd.f32 %v2067_v1, %v2066_v62  ;;  %v2149_v3 = vpop.f32.mrf.mxu1 }
 0x12f   :  { %v2150_v4 = vadd.f32 %v2149_v3, %v2148_v63  ;;  %v2069_v5 = vpop.f32.mrf.mxu0 }
 0x130   :  { %v2151_v6 = vpop.f32.mrf.mxu1 }
 0x131   :  { %v2705_v7 = vadd.f32 %v2150_v4, %v2068_v2  ;;  %v2070_v8 = vpop.f32.mrf.mxu0 }
 0x132   :  { %v2071_v9 = vadd.f32 %v2070_v8, %v2069_v5  ;;  %v2152_v10 = vpop.f32.mrf.mxu1 }
 0x133   :  { %v2153_v11 = vadd.f32 %v2152_v10, %v2151_v6  ;;  %v2072_v12 = vpop.f32.mrf.mxu0 }
 0x134   :  { %v2154_v13 = vpop.f32.mrf.mxu1 }
 0x135   :  { %v2707_v14 = vadd.f32 %v2153_v11, %v2071_v9  ;;  %v2073_v16 = vpop.f32.mrf.mxu0 }
 0x136   :  { %v2074_v17 = vadd.f32 %v2073_v16, %v2072_v12  ;;  %v2155_v18 = vpop.f32.mrf.mxu1 }
 0x137   :  { %v2156_v19 = vadd.f32 %v2155_v18, %v2154_v13  ;;  %v2075_v20 = vpop.f32.mrf.mxu0 }
 0x138   :  { %v2157_v36 = vpop.f32.mrf.mxu1 }
 0x139   :  { %v2709_v22 = vadd.f32 %v2156_v19, %v2074_v17  ;;  %v2076_v23 = vpop.f32.mrf.mxu0 }
 0x13a   :  { %v2077_v24 = vadd.f32 %v2076_v23, %v2075_v20  ;;  %v2158_v25 = vpop.f32.mrf.mxu1 }
 0x13b   :  { %v2159_v26 = vadd.f32 %v2158_v25, %v2157_v36  ;;  %v2078_v27 = vpop.f32.mrf.mxu0 }
 0x13c   :  { %v2160_v29 = vpop.f32.mrf.mxu1 }
 0x13d   :  { %v2711_v30 = vadd.f32 %v2159_v26, %v2077_v24  ;;  %v2079_v31 = vpop.f32.mrf.mxu0 }
 0x13e   :  { %v2080_v32 = vadd.f32 %v2079_v31, %v2078_v27  ;;  %v2161_v33 = vpop.f32.mrf.mxu1 }
 0x13f   :  { %v2162_v34 = vadd.f32 %v2161_v33, %v2160_v29  ;;  %v2081_v37 = vpop.f32.mrf.mxu0 }
 0x140   :  { %v2163_v38 = vpop.f32.mrf.mxu1 }
 0x141   :  { %v2713_v39 = vadd.f32 %v2162_v34, %v2080_v32  ;;  %v2082_v40 = vpop.f32.mrf.mxu0 }
 0x142   :  { %v2083_v41 = vadd.f32 %v2082_v40, %v2081_v37  ;;  %v2164_v42 = vpop.f32.mrf.mxu1 }
 0x143   :  { %v2165_v44 = vadd.f32 %v2164_v42, %v2163_v38  ;;  %v2084_v45 = vpop.f32.mrf.mxu0 }
 0x144   :  { %v2166_v46 = vpop.f32.mrf.mxu1 }
 0x145   :  { %v2715_v47 = vadd.f32 %v2165_v44, %v2083_v41  ;;  %v2085_v48 = vpop.f32.mrf.mxu0 }
 0x146   :  { %v2086_v49 = vadd.f32 %v2085_v48, %v2084_v45  ;;  %v2167_v51 = vpop.f32.mrf.mxu1 }
 0x147   :  { %v2168_v52 = vadd.f32 %v2167_v51, %v2166_v46  ;;  %v2087_v53 = vpop.f32.mrf.mxu0 }
 0x148   :  { %v2169_v54 = vpop.f32.mrf.mxu1 }
 0x149   :  { %v2717_v55 = vadd.f32 %v2168_v52, %v2086_v49  ;;  %v2088_v56 = vpop.f32.mrf.mxu0 }
 0x14a   :  { %v2089_v58 = vadd.f32 %v2088_v56, %v2087_v53  ;;  %v2170_v59 = vpop.f32.mrf.mxu1 }
 0x14b   :  { %v2171_v60 = vadd.f32 %v2170_v59, %v2169_v54  ;;  %v2090_v61 = vpop.f32.mrf.mxu0 }
 0x14c   :  { %v2172_v62 = vpop.f32.mrf.mxu1 }
 0x14d   :  { %v2719_v63 = vadd.f32 %v2171_v60, %v2089_v58  ;;  %v2091_v1 = vpop.f32.mrf.mxu0 }
 0x14e   :  { %v2092_v2 = vadd.f32 %v2091_v1, %v2090_v61  ;;  %v2173_v3 = vpop.f32.mrf.mxu1 }
 0x14f   :  { %v2174_v4 = vadd.f32 %v2173_v3, %v2172_v62  ;;  %v2093_v5 = vpop.f32.mrf.mxu0 }
 0x150   :  { %v2175_v6 = vpop.f32.mrf.mxu1 }
 0x151   :  { %v2721_v8 = vadd.f32 %v2174_v4, %v2092_v2  ;;  %v2094_v9 = vpop.f32.mrf.mxu0 }
 0x152   :  { %v2095_v10 = vadd.f32 %v2094_v9, %v2093_v5  ;;  %v2176_v11 = vpop.f32.mrf.mxu1  ;;  %v1590_v5 = vld [vmem:[#allocation8] sm:$0xff] }
 0x153   :  { %v2177_v12 = vadd.f32 %v2176_v11, %v2175_v6  ;;  %v2096_v13 = vpop.f32.mrf.mxu0  ;;  %v1591_v11 = vld [vmem:[#allocation8 + $0x8] sm:$0xff] }
 0x154   :  { %v2178_v16 = vpop.f32.mrf.mxu1 }
 0x155   :  { %v2723_v17 = vadd.f32 %v2177_v12, %v2095_v10  ;;  %v2097_v18 = vpop.f32.mrf.mxu0 }
 0x156   :  { %v2098_v19 = vadd.f32 %v2097_v18, %v2096_v13  ;;  %v2179_v20 = vpop.f32.mrf.mxu1 }
 0x157   :  { %v2180_v36 = vadd.f32 %v2179_v20, %v2178_v16  ;;  %v2099_v23 = vpop.f32.mrf.mxu0 }
 0x158   :  { %v2181_v24 = vpop.f32.mrf.mxu1 }
 0x159   :  { %v2725_v25 = vadd.f32 %v2180_v36, %v2098_v19  ;;  %v2100_v26 = vpop.f32.mrf.mxu0 }
 0x15a   :  { %v2101_v27 = vadd.f32 %v2100_v26, %v2099_v23  ;;  %v2182_v29 = vpop.f32.mrf.mxu1 }
 0x15b   :  { %v2183_v31 = vadd.f32 %v2182_v29, %v2181_v24  ;;  %v2102_v32 = vpop.f32.mrf.mxu0 }
 0x15c   :  { %v2184_v33 = vpop.f32.mrf.mxu1 }
 0x15d   :  { %v2727_v34 = vadd.f32 %v2183_v31, %v2101_v27  ;;  %v2103_v37 = vpop.f32.mrf.mxu0 }
 0x15e   :  { %v2104_v38 = vadd.f32 %v2103_v37, %v2102_v32  ;;  %v2185_v40 = vpop.f32.mrf.mxu1 }
 0x15f   :  { %v2186_v41 = vadd.f32 %v2185_v40, %v2184_v33  ;;  %v2105_v42 = vpop.f32.mrf.mxu0  ;;  %v1592_v33 = vld [vmem:[#allocation8 + $0x10] sm:$0xff] }
 0x160   :  { %v2187_v44 = vpop.f32.mrf.mxu1 }
 0x161   :  { %v2729_v45 = vadd.f32 %v2186_v41, %v2104_v38  ;;  %v2106_v46 = vpop.f32.mrf.mxu0  ;;  %v1593_v41 = vld [vmem:[#allocation8 + $0x18] sm:$0xff] }
 0x162   :  { %v2107_v48 = vadd.f32 %v2106_v46, %v2105_v42  ;;  %v2188_v49 = vpop.f32.mrf.mxu1 }
 0x163   :  { %v2189_v51 = vadd.f32 %v2188_v49, %v2187_v44  ;;  %v2206_v52 = vpop.f32.mrf.mxu0 }
 0x164   :  { %v1434_v53 = vpop.f32.mrf.mxu1 }
 0x165   :  { %v2731_v54 = vadd.f32 %v2189_v51, %v2107_v48  ;;  %v2207_v56 = vpop.f32.mrf.mxu0 }
 0x166   :  { %v2208_v58 = vadd.f32 %v2207_v56, %v2206_v52  ;;  %v2309_v59 = vpop.f32.mrf.mxu1 }
 0x167   :  { %v2209_v60 = vpop.f32.mrf.mxu0 }
 0x168   :  { %v1314_v61 = vadd.f32 %v2208_v58, %v2689_v15  ;;  %v1437_v62 = vpop.f32.mrf.mxu1 }
 0x169   :  { %v2210_v1 = vpop.f32.mrf.mxu0 }
 0x16a   :  { %v1435_v2 = vadd.f32 %v1434_v53, %v1314_v61  ;;  %v2211_v3 = vadd.f32 %v2210_v1, %v2209_v60  ;;  %v2310_v4 = vpop.f32.mrf.mxu1 }
 0x16b   :  { %v2212_v6 = vpop.f32.mrf.mxu0 }
 0x16c   :  { %v1317_v9 = vadd.f32 %v2211_v3, %v2691_v21  ;;  %v1442_v10 = vpop.f32.mrf.mxu1  ;;  %v1612_v13 = vadd.f32 %v1590_v5, %v1435_v2  ;;  %v1595_v5 = vld [vmem:[#allocation8 + $0x28] sm:$0xff] }
 0x16d   :  { %v2213_v12 = vpop.f32.mrf.mxu0 }
 0x16e   :  { %v1438_v16 = vadd.f32 %v1437_v62, %v1317_v9  ;;  %v2214_v18 = vadd.f32 %v2213_v12, %v2212_v6  ;;  %v2313_v19 = vpop.f32.mrf.mxu1  ;;  %v1634_v26 = vmax.f32 %v1612_v13, 0.0 }
 0x16f   :  { %v2215_v20 = vpop.f32.mrf.mxu0 }
 0x170   :  { %v1613_v36 = vadd.f32 %v1591_v11, %v1438_v16  ;;  %v1322_v15 = vadd.f32 %v2214_v18, %v2693_v28  ;;  %v1445_v23 = vpop.f32.mrf.mxu1 }
 0x171   :  { %v2216_v24 = vpop.f32.mrf.mxu0 }
 0x172   :  { %v1635_v27 = vmax.f32 %v1613_v36, 0.0  ;;  %v1443_v29 = vadd.f32 %v1442_v10, %v1322_v15  ;;  %v2217_v31 = vadd.f32 %v2216_v24, %v2215_v20  ;;  %v2314_v32 = vpop.f32.mrf.mxu1 }
 0x173   :  { %v2218_v21 = vpop.f32.mrf.mxu0  ;;  %v1597_v32 = vld [vmem:[#allocation8 + $0x38] sm:$0xff] }
 0x174   :  { %v1964_v37 = vpack.c.bf16 %v1635_v27, %v1634_v26  ;;  %v1325_v38 = vadd.f32 %v2217_v31, %v2695_v35  ;;  %v1450_v40 = vpop.f32.mrf.mxu1  ;;  %v1614_v44 = vadd.f32 %v1592_v33, %v1443_v29  ;;  %v1594_v35 = vld [vmem:[#allocation8 + $0x20] sm:$0xff] }
 0x175   :  { %v2219_v42 = vpop.f32.mrf.mxu0 }
 0x176   :  { %1965 = vst [vmem:[#allocation9] sm:$0xff] %v1964_v37   ;;  %v1446_v46 = vadd.f32 %v1445_v23, %v1325_v38  ;;  %v2220_v48 = vadd.f32 %v2219_v42, %v2218_v21  ;;  %v2317_v28 = vpop.f32.mrf.mxu1  ;;  %v1636_v58 = vmax.f32 %v1614_v44, 0.0 }
 0x177   :  { %v2221_v49 = vpop.f32.mrf.mxu0 }
 0x178   :  { %v1615_v51 = vadd.f32 %v1593_v41, %v1446_v46  ;;  %v1330_v52 = vadd.f32 %v2220_v48, %v2697_v43  ;;  %v1453_v53 = vpop.f32.mrf.mxu1 }
 0x179   :  { %v2222_v56 = vpop.f32.mrf.mxu0 }
 0x17a   :  { %v1637_v59 = vmax.f32 %v1615_v51, 0.0  ;;  %v1451_v60 = vadd.f32 %v1450_v40, %v1330_v52  ;;  %v2223_v61 = vadd.f32 %v2222_v56, %v2221_v49  ;;  %v2318_v62 = vpop.f32.mrf.mxu1 }
 0x17b   :  { %v2224_v1 = vpop.f32.mrf.mxu0 }
 0x17c   :  { %v1969_v2 = vpack.c.bf16 %v1637_v59, %v1636_v58  ;;  %v1333_v3 = vadd.f32 %v2223_v61, %v2699_v50  ;;  %v1458_v4 = vpop.f32.mrf.mxu1  ;;  %v1616_v9 = vadd.f32 %v1594_v35, %v1451_v60  ;;  %v1596_v50 = vld [vmem:[#allocation8 + $0x30] sm:$0xff]  ;;  %v1599_v60 = vld [vmem:[#allocation8 + $0x48] sm:$0xff] }
 0x17d   :  { %v2225_v6 = vpop.f32.mrf.mxu0 }
 0x17e   :  { %2016 = vst [vmem:[#allocation9 + $0x8] sm:$0xff] %v1969_v2   ;;  %v1454_v10 = vadd.f32 %v1453_v53, %v1333_v3  ;;  %v2226_v11 = vadd.f32 %v2225_v6, %v2224_v1  ;;  %v2321_v43 = vpop.f32.mrf.mxu1  ;;  %v1638_v20 = vmax.f32 %v1616_v9, 0.0 }
 0x17f   :  { %v2227_v12 = vpop.f32.mrf.mxu0 }
 0x180   :  { %v1617_v13 = vadd.f32 %v1595_v5, %v1454_v10  ;;  %v1338_v16 = vadd.f32 %v2226_v11, %v2701_v57  ;;  %v1461_v18 = vpop.f32.mrf.mxu1 }
 0x181   :  { %v2228_v19 = vpop.f32.mrf.mxu0 }
 0x182   :  { %v1639_v36 = vmax.f32 %v1617_v13, 0.0  ;;  %v1459_v15 = vadd.f32 %v1458_v4, %v1338_v16  ;;  %v2229_v23 = vadd.f32 %v2228_v19, %v2227_v12  ;;  %v2322_v24 = vpop.f32.mrf.mxu1 }
 0x183   :  { %v2230_v26 = vpop.f32.mrf.mxu0 }
 0x184   :  { %v1974_v27 = vpack.c.bf16 %v1639_v36, %v1638_v20  ;;  %v1341_v29 = vadd.f32 %v2229_v23, %v2703_v0  ;;  %v1466_v31 = vpop.f32.mrf.mxu1  ;;  %v1618_v21 = vadd.f32 %v1596_v50, %v1459_v15  ;;  %v1598_v0 = vld [vmem:[#allocation8 + $0x40] sm:$0xff]  ;;  %v1601_v20 = vld [vmem:[#allocation8 + $0x58] sm:$0xff] }
 0x185   :  { %v2231_v33 = vpop.f32.mrf.mxu0 }
 0x186   :  { %2017 = vst [vmem:[#allocation9 + $0x10] sm:$0xff] %v1974_v27   ;;  %v1462_v37 = vadd.f32 %v1461_v18, %v1341_v29  ;;  %v2232_v38 = vadd.f32 %v2231_v33, %v2230_v26  ;;  %v2325_v57 = vpop.f32.mrf.mxu1  ;;  %v1640_v48 = vmax.f32 %v1618_v21, 0.0 }
 0x187   :  { %v2233_v40 = vpop.f32.mrf.mxu0 }
 0x188   :  { %v1619_v41 = vadd.f32 %v1597_v32, %v1462_v37  ;;  %v1346_v42 = vadd.f32 %v2232_v38, %v2705_v7  ;;  %v1469_v44 = vpop.f32.mrf.mxu1 }
 0x189   :  { %v2234_v46 = vpop.f32.mrf.mxu0 }
 0x18a   :  { %v1641_v28 = vmax.f32 %v1619_v41, 0.0  ;;  %v1467_v49 = vadd.f32 %v1466_v31, %v1346_v42  ;;  %v2235_v51 = vadd.f32 %v2234_v46, %v2233_v40  ;;  %v2326_v52 = vpop.f32.mrf.mxu1 }
 0x18b   :  { %v2236_v53 = vpop.f32.mrf.mxu0 }
 0x18c   :  { %v1979_v56 = vpack.c.bf16 %v1641_v28, %v1640_v48  ;;  %v1349_v58 = vadd.f32 %v2235_v51, %v2707_v14  ;;  %v1474_v59 = vpop.f32.mrf.mxu1  ;;  %v1620_v62 = vadd.f32 %v1598_v0, %v1467_v49  ;;  %v1600_v14 = vld [vmem:[#allocation8 + $0x50] sm:$0xff] }
 0x18d   :  { %v2237_v61 = vpop.f32.mrf.mxu0 }
 0x18e   :  { %2018 = vst [vmem:[#allocation9 + $0x18] sm:$0xff] %v1979_v56   ;;  %v1470_v35 = vadd.f32 %v1469_v44, %v1349_v58  ;;  %v2238_v1 = vadd.f32 %v2237_v61, %v2236_v53  ;;  %v2329_v7 = vpop.f32.mrf.mxu1  ;;  %v1642_v9 = vmax.f32 %v1620_v62, 0.0  ;;  %v1603_v44 = vld [vmem:[#allocation8 + $0x68] sm:$0xff] }
 0x18f   :  { %v2239_v2 = vpop.f32.mrf.mxu0 }
 0x190   :  { %v1621_v3 = vadd.f32 %v1599_v60, %v1470_v35  ;;  %v1354_v4 = vadd.f32 %v2238_v1, %v2709_v22  ;;  %v1477_v5 = vpop.f32.mrf.mxu1 }
 0x191   :  { %v2240_v6 = vpop.f32.mrf.mxu0 }
 0x192   :  { %v1643_v10 = vmax.f32 %v1621_v3, 0.0  ;;  %v1475_v11 = vadd.f32 %v1474_v59, %v1354_v4  ;;  %v2241_v43 = vadd.f32 %v2240_v6, %v2239_v2  ;;  %v2330_v12 = vpop.f32.mrf.mxu1  ;;  %v1605_v3 = vld [vmem:[#allocation8 + $0x78] sm:$0xff] }
 0x193   :  { %v2242_v13 = vpop.f32.mrf.mxu0 }
 0x194   :  { %v1984_v16 = vpack.c.bf16 %v1643_v10, %v1642_v9  ;;  %v1357_v18 = vadd.f32 %v2241_v43, %v2711_v30  ;;  %v1482_v19 = vpop.f32.mrf.mxu1  ;;  %v1622_v15 = vadd.f32 %v1600_v14, %v1475_v11  ;;  %v1602_v30 = vld [vmem:[#allocation8 + $0x60] sm:$0xff] }
 0x195   :  { %v2243_v36 = vpop.f32.mrf.mxu0 }
 0x196   :  { %2019 = vst [vmem:[#allocation9 + $0x20] sm:$0xff] %v1984_v16   ;;  %v1478_v23 = vadd.f32 %v1477_v5, %v1357_v18  ;;  %v2244_v24 = vadd.f32 %v2243_v36, %v2242_v13  ;;  %v2333_v22 = vpop.f32.mrf.mxu1  ;;  %v1644_v32 = vmax.f32 %v1622_v15, 0.0 }
 0x197   :  { %v2245_v50 = vpop.f32.mrf.mxu0  ;;  %v1607_v22 = vld [vmem:[#allocation8 + $0x88] sm:$0xff] }
 0x198   :  { %v1623_v26 = vadd.f32 %v1601_v20, %v1478_v23  ;;  %v1362_v27 = vadd.f32 %v2244_v24, %v2713_v39  ;;  %v1485_v29 = vpop.f32.mrf.mxu1 }
 0x199   :  { %v2246_v31 = vpop.f32.mrf.mxu0 }
 0x19a   :  { %v1645_v33 = vmax.f32 %v1623_v26, 0.0  ;;  %v1483_v21 = vadd.f32 %v1482_v19, %v1362_v27  ;;  %v2247_v37 = vadd.f32 %v2246_v31, %v2245_v50  ;;  %v2334_v38 = vpop.f32.mrf.mxu1 }
 0x19b   :  { %v2248_v57 = vpop.f32.mrf.mxu0 }
 0x19c   :  { %v1989_v40 = vpack.c.bf16 %v1645_v33, %v1644_v32  ;;  %v1365_v41 = vadd.f32 %v2247_v37, %v2715_v47  ;;  %v1490_v42 = vpop.f32.mrf.mxu1  ;;  %v1624_v48 = vadd.f32 %v1602_v30, %v1483_v21  ;;  %v1604_v47 = vld [vmem:[#allocation8 + $0x70] sm:$0xff] }
 0x19d   :  { %v2249_v46 = vpop.f32.mrf.mxu0 }
 0x19e   :  { %2020 = vst [vmem:[#allocation9 + $0x28] sm:$0xff] %v1989_v40   ;;  %v1486_v28 = vadd.f32 %v1485_v29, %v1365_v41  ;;  %v2250_v49 = vadd.f32 %v2249_v46, %v2248_v57  ;;  %v2337_v39 = vpop.f32.mrf.mxu1  ;;  %v1646_v58 = vmax.f32 %v1624_v48, 0.0 }
 0x19f   :  { %v2251_v51 = vpop.f32.mrf.mxu0 }
 0x1a0   :  { %v1625_v52 = vadd.f32 %v1603_v44, %v1486_v28  ;;  %v1370_v0 = vadd.f32 %v2250_v49, %v2717_v55  ;;  %v1493_v53 = vpop.f32.mrf.mxu1  ;;  %v1609_v28 = vld [vmem:[#allocation8 + $0x98] sm:$0xff] }
 0x1a1   :  { %v2252_v56 = vpop.f32.mrf.mxu0 }
 0x1a2   :  { %v1647_v59 = vmax.f32 %v1625_v52, 0.0  ;;  %v1491_v60 = vadd.f32 %v1490_v42, %v1370_v0  ;;  %v2253_v61 = vadd.f32 %v2252_v56, %v2251_v51  ;;  %v2338_v62 = vpop.f32.mrf.mxu1 }
 0x1a3   :  { %v2254_v35 = vpop.f32.mrf.mxu0 }
 0x1a4   :  { %v1994_v1 = vpack.c.bf16 %v1647_v59, %v1646_v58  ;;  %v1373_v7 = vadd.f32 %v2253_v61, %v2719_v63  ;;  %v1498_v2 = vpop.f32.mrf.mxu1  ;;  %v1626_v5 = vadd.f32 %v1604_v47, %v1491_v60  ;;  %v1606_v63 = vld [vmem:[#allocation8 + $0x80] sm:$0xff] }
 0x1a5   :  { %v2255_v4 = vpop.f32.mrf.mxu0 }
 0x1a6   :  { %2021 = vst [vmem:[#allocation9 + $0x30] sm:$0xff] %v1994_v1   ;;  %v1494_v6 = vadd.f32 %v1493_v53, %v1373_v7  ;;  %v2256_v9 = vadd.f32 %v2255_v4, %v2254_v35  ;;  %v2341_v55 = vpop.f32.mrf.mxu1  ;;  %v1648_v13 = vmax.f32 %v1626_v5, 0.0 }
 0x1a7   :  { %v2257_v10 = vpop.f32.mrf.mxu0 }
 0x1a8   :  { %v1627_v11 = vadd.f32 %v1605_v3, %v1494_v6  ;;  %v1378_v43 = vadd.f32 %v2256_v9, %v2721_v8  ;;  %v1501_v12 = vpop.f32.mrf.mxu1 }
 0x1a9   :  { %v2258_v14 = vpop.f32.mrf.mxu0 }
 0x1aa   :  { %v1649_v16 = vmax.f32 %v1627_v11, 0.0  ;;  %v1499_v18 = vadd.f32 %v1498_v2, %v1378_v43  ;;  %v2259_v19 = vadd.f32 %v2258_v14, %v2257_v10  ;;  %v2342_v20 = vpop.f32.mrf.mxu1  ;;  %v1611_v2 = vld [vmem:[#allocation8 + $0xa8] sm:$0xff] }
 0x1ab   :  { %v2260_v36 = vpop.f32.mrf.mxu0 }
 0x1ac   :  { %v1999_v15 = vpack.c.bf16 %v1649_v16, %v1648_v13  ;;  %v1381_v23 = vadd.f32 %v2259_v19, %v2723_v17  ;;  %v1506_v24 = vpop.f32.mrf.mxu1  ;;  %v1628_v26 = vadd.f32 %v1606_v63, %v1499_v18  ;;  %v1608_v17 = vld [vmem:[#allocation8 + $0x90] sm:$0xff] }
 0x1ad   :  { %v2261_v50 = vpop.f32.mrf.mxu0 }
 0x1ae   :  { %2022 = vst [vmem:[#allocation9 + $0x38] sm:$0xff] %v1999_v15   ;;  %v1502_v27 = vadd.f32 %v1501_v12, %v1381_v23  ;;  %v2262_v29 = vadd.f32 %v2261_v50, %v2260_v36  ;;  %v2345_v8 = vpop.f32.mrf.mxu1  ;;  %v1650_v38 = vmax.f32 %v1628_v26, 0.0 }
 0x1af   :  { %v2263_v31 = vpop.f32.mrf.mxu0 }
 0x1b0   :  { %v1629_v32 = vadd.f32 %v1607_v22, %v1502_v27  ;;  %v1386_v33 = vadd.f32 %v2262_v29, %v2725_v25  ;;  %v1509_v21 = vpop.f32.mrf.mxu1 }
 0x1b1   :  { %v2264_v37 = vpop.f32.mrf.mxu0 }
 0x1b2   :  { %v1651_v30 = vmax.f32 %v1629_v32, 0.0  ;;  %v1507_v57 = vadd.f32 %v1506_v24, %v1386_v33  ;;  %v2265_v40 = vadd.f32 %v2264_v37, %v2263_v31  ;;  %v2346_v41 = vpop.f32.mrf.mxu1 }
 0x1b3   :  { %v2266_v42 = vpop.f32.mrf.mxu0 }
 0x1b4   :  { %v2004_v44 = vpack.c.bf16 %v1651_v30, %v1650_v38  ;;  %v1389_v46 = vadd.f32 %v2265_v40, %v2727_v34  ;;  %v1514_v48 = vpop.f32.mrf.mxu1  ;;  %v1630_v39 = vadd.f32 %v1608_v17, %v1507_v57  ;;  %v1610_v34 = vld [vmem:[#allocation8 + $0xa0] sm:$0xff] }
 0x1b5   :  { %v2267_v49 = vpop.f32.mrf.mxu0 }
 0x1b6   :  { %2023 = vst [vmem:[#allocation9 + $0x40] sm:$0xff] %v2004_v44   ;;  %v1510_v51 = vadd.f32 %v1509_v21, %v1389_v46  ;;  %v2268_v52 = vadd.f32 %v2267_v49, %v2266_v42  ;;  %v2349_v25 = vpop.f32.mrf.mxu1  ;;  %v1652_v60 = vmax.f32 %v1630_v39, 0.0 }
 0x1b7   :  { %v2269_v0 = vpop.f32.mrf.mxu0 }
 0x1b8   :  { %v1631_v53 = vadd.f32 %v1609_v28, %v1510_v51  ;;  %v1394_v56 = vadd.f32 %v2268_v52, %v2729_v45  ;;  %v1517_v58 = vpop.f32.mrf.mxu1 }
 0x1b9   :  { %v2270_v59 = vpop.f32.mrf.mxu0 }
 0x1ba   :  { %v1653_v61 = vmax.f32 %v1631_v53, 0.0  ;;  %v1515_v62 = vadd.f32 %v1514_v48, %v1394_v56  ;;  %v2271_v47 = vadd.f32 %v2270_v59, %v2269_v0  ;;  %v2350_v35 = vpop.f32.mrf.mxu1 }
 0x1bc   :  { %v2009_v1 = vpack.c.bf16 %v1653_v61, %v1652_v60  ;;  %v1397_v7 = vadd.f32 %v2271_v47, %v2731_v54  ;;  %v1632_v3 = vadd.f32 %v1610_v34, %v1515_v62 }
 0x1be   :  { %2024 = vst [vmem:[#allocation9 + $0x48] sm:$0xff] %v2009_v1   ;;  %v1518_v4 = vadd.f32 %v1517_v58, %v1397_v7  ;;  %v1654_v6 = vmax.f32 %v1632_v3, 0.0 }
 0x1c0   :  { %v1633_v5 = vadd.f32 %v1611_v2, %v1518_v4 }
 0x1c2   :  { %v1655_v45 = vmax.f32 %v1633_v5, 0.0 }
 0x1c4   :  { %v2014_v9 = vpack.c.bf16 %v1655_v45, %v1654_v6 }
 0x1c6   :  { %2025 = vst [vmem:[#allocation9 + $0x50] sm:$0xff] %v2014_v9  }
 0x1c7   :  { %2600 = shalt.err (!%p2597_p5)
}
 0x1c8   :  { %1777 = dma.vmem_to_hbm [thread:$0]  %s1772_s2, 1408, %s2764_s3, [#allocation5], %s2616_s15, %s2616_s15, %s2617_s16  }
 0x1c9   :  { %2613 = dma.done.wait [#allocation5], 1408  }
 0x1ca   :  { %2614 = vsyncadd [#allocation5], 4294965888 }
 0x1cb   :  { %1781 = vsyncpa [#allocation4], 1 }
 0x1cc   :  { %1782 = vsyncpa [#allocation7], 1 }
 0x1cd   :  { %1783 = vsyncpa [#allocation5], 1 }

</bundles_post_ra>
